<compile_context>
chip_gen: v5e
topology: v5e:2x2
jax: 0.10.0
libtpu: 0.0.40
codegen_flags: <defaults>
</compile_context>

<pallas_src>
import functools

import jax
import jax.numpy as jnp
from jax.experimental import pallas as pl
from jax.experimental.pallas import tpu as pltpu

KEEP_PROB = 0.9

_TARGET_BLOCK_BYTES = 4 << 20      # ~4 MiB of f32 per operand per grid block
_MIN_GRID = 4                      # keep >=4 blocks so v7x megacore has work
_VMEM_LIMIT_BYTES = 40 << 20       # > 2*(4+4+1) MiB pass-2 footprint, < 64 MiB
                                   # physical VMEM on every target chip


def _pick_row_block(rows, row_bytes, align=8,
                    target_bytes=_TARGET_BLOCK_BYTES, min_grid=_MIN_GRID):
    """Largest row count that divides `rows`, is a multiple of `align` (or the
    full extent, per the (8,128)/native-tile block rules), keeps one operand
    block <= target_bytes, and -- when possible -- leaves the grid >= min_grid
    steps so the "parallel" axis can be sharded across both v7x TensorCores."""
    cands = [d for d in range(1, rows + 1)
             if rows % d == 0 and (d % align == 0 or d == rows)]
    fitting = [d for d in cands if d * row_bytes <= target_bytes]
    if not fitting:
        return min(cands)
    multi = [d for d in fitting if rows // d >= min_grid]
    return max(multi) if multi else max(fitting)
    # TODO(synk): for awkward n*c factorizations the divisor constraint can
    # collapse the block far below target; a pl.cdiv grid with an in-kernel
    # ragged-row mask on the kept-count would decouple block size from the
    # factorization (review item), at the cost of extra masking logic.


def _threshold_kernel(keep_prob, mask_ref, binm_ref, psum_ref):
    """binm = (mask < keep_prob) as int8 ; psum = per-block kept count (f32)."""
    keep = (mask_ref[...] < keep_prob).astype(jnp.float32)      # 1.0 / 0.0
    binm_ref[...] = keep.astype(jnp.int8)
    # (R, L) -> (R, 1) -> (1, 1); lane reduce then sublane reduce.
    psum_ref[...] = jnp.sum(jnp.sum(keep, axis=1, keepdims=True),
                            axis=0, keepdims=True)


def _apply_kernel(scale_ref, x_ref, binm_ref, out_ref):
    """out = x * binm * scale; scale = numel/count precomputed, read from SMEM."""
    # NOTE: if count == 0 (every element dropped) scale is +inf and the output
    # is NaN, matching the torch reference (0 * inf); not clamped on purpose.
    scale = scale_ref[0, 0]
    binm = binm_ref[...].astype(jnp.float32)                    # 0.0 / 1.0
    out_ref[...] = (x_ref[...] * (binm * scale)).astype(out_ref.dtype)


def dropblock_t_1d(x, mask, keep_prob=KEEP_PROB):
    """x: (n, c, t, v) float32 ; mask: (n, c*v, t) float32."""
    n, c, t, v = x.shape
    cv = c * v
    assert mask.shape == (n, cv, t)

    rows = n * c
    mlane = v * t          # mask lane width in its native (n, c, v, t) order
    xlane = t * v          # x / out lane width in the native (n, c, t, v) order
    if xlane % 128 != 0:
        # Correct but slower: the main f32 output store becomes masked vst.
        # TODO(synk): pad the lane dim (or re-flatten) for non-128-multiple t*v.
        pass

    compiler_params = pltpu.CompilerParams(
        dimension_semantics=("parallel",),
        vmem_limit_bytes=_VMEM_LIMIT_BYTES)

    # ---- Pass 1: threshold + per-block partial counts (lane-dense view) ----
    mask2d = mask.reshape(rows, mlane)                       # free reshape
    rb1 = _pick_row_block(rows, mlane * 4, align=32)         # int8 out in block
    g1 = rows // rb1
    binm2d, pcounts = pl.pallas_call(
        functools.partial(_threshold_kernel, float(keep_prob)),
        out_shape=(jax.ShapeDtypeStruct((rows, mlane), jnp.int8),
                   jax.ShapeDtypeStruct((g1, 1), jnp.float32)),
        grid=(g1,),
        in_specs=[pl.BlockSpec((rb1, mlane), lambda i: (i, 0))],
        out_specs=(pl.BlockSpec((rb1, mlane), lambda i: (i, 0)),
                   pl.BlockSpec((1, 1), lambda i: (i, 0))),
        compiler_params=compiler_params,
    )(mask2d)

    # Tiny cross-block reduction + the single scalar divide, hoisted out of
    # pass 2 so the kernel body has no per-grid-step divide / extra SMEM read.
    scale = (jnp.float32(mask.size) / jnp.sum(pcounts)).reshape(1, 1)

    # Only remaining layout op: bring the int8 binary mask into x's native
    # (n, c, t, v) layout (4x cheaper than transposing x / out in f32).
    binm_t2d = jnp.transpose(binm2d.reshape(n, c, v, t),
                             (0, 1, 3, 2)).reshape(rows, xlane)

    # ---- Pass 2: lane-dense elementwise apply in x's native layout ----
    x2d = x.reshape(rows, xlane)                             # free reshape
    rb2 = _pick_row_block(rows, xlane * 4, align=32)         # int8 in block
    g2 = rows // rb2
    out2d = pl.pallas_call(
        _apply_kernel,
        out_shape=jax.ShapeDtypeStruct((rows, xlane), x.dtype),
        grid=(g2,),
        in_specs=[
            pl.BlockSpec((1, 1), lambda i: (0, 0),
                         memory_space=pltpu.MemorySpace.SMEM),
            pl.BlockSpec((rb2, xlane), lambda i: (i, 0)),
            pl.BlockSpec((rb2, xlane), lambda i: (i, 0)),
        ],
        out_specs=pl.BlockSpec((rb2, xlane), lambda i: (i, 0)),
        compiler_params=compiler_params,
    )(scale, x2d, binm_t2d)

    return out2d.reshape(n, c, t, v)                         # free reshape


def _reference(x, mask, keep_prob=KEEP_PROB):
    n, c, t, v = x.shape
    x1 = jnp.transpose(x, (0, 1, 3, 2)).reshape(n, c * v, t)
    binm = (mask < keep_prob).astype(jnp.float32)
    out1 = x1 * binm * (jnp.float32(mask.size) / jnp.sum(binm))
    return out1.reshape(n, c, v, t).transpose(0, 1, 3, 2)


if __name__ == "__main__":
    n, c, t, v = 2, 4, 16, 16
    key = jax.random.PRNGKey(0)
    kx, km = jax.random.split(key)
    x = jax.random.normal(kx, (n, c, t, v), dtype=jnp.float32)
    # mask in [0, 1): ~10% of entries >= keep_prob get dropped
    mask = jax.random.uniform(km, (n, c * v, t), dtype=jnp.float32)

    out = jax.block_until_ready(jax.jit(dropblock_t_1d)(x, mask))
    ref = _reference(x, mask)

    assert out.shape == (n, c, t, v)
    assert jnp.allclose(out, ref, rtol=1e-5, atol=1e-5)
    print("KERNEL_OK")
</pallas_src>

<mosaic_0001>
module attributes {stable_mosaic.version = 11 : i64} {
  func.func @_threshold_kernel(%arg0: i32, %arg1: memref<8x256xf32, #tpu.memory_space<vmem>>, %arg2: memref<8x256xi8, #tpu.memory_space<vmem>>, %arg3: memref<1x1xf32, #tpu.memory_space<vmem>>) attributes {dimension_semantics = [#tpu.dimension_semantics<parallel>], iteration_bounds = array<i64: 1>, scalar_prefetch = 0 : i64, scratch_operands = 0 : i64, tpu.core_type = #tpu.core_type<tc>, window_params = [{transform_indices = @transform_0, window_bounds = array<i64: 8, 256>}, {transform_indices = @transform_1, window_bounds = array<i64: 8, 256>}, {transform_indices = @transform_2, window_bounds = array<i64: 1, 1>}]} {
    %c0 = arith.constant 0 : index
    %c0_0 = arith.constant 0 : index
    %0 = vector.load %arg1[%c0, %c0_0] : memref<8x256xf32, #tpu.memory_space<vmem>>, vector<8x256xf32>
    %cst = arith.constant 0.899999976 : f32
    %1 = vector.broadcast %cst : f32 to vector<8x256xf32>
    %2 = arith.cmpf olt, %0, %1 : vector<8x256xf32>
    %3 = arith.extui %2 : vector<8x256xi1> to vector<8x256xi32>
    %4 = arith.sitofp %3 : vector<8x256xi32> to vector<8x256xf32>
    %5 = arith.fptosi %4 : vector<8x256xf32> to vector<8x256xi8>
    %c0_1 = arith.constant 0 : index
    %c0_2 = arith.constant 0 : index
    %6 = vector.load %arg2[%c0_1, %c0_2] : memref<8x256xi8, #tpu.memory_space<vmem>>, vector<8x256xi8>
    tpu.vector_store %arg2[%c0_1, %c0_2], %5 {strides = array<i32>} : memref<8x256xi8, #tpu.memory_space<vmem>>, vector<8x256xi8>,
    %cst_3 = arith.constant dense<0.000000e+00> : vector<8xf32>
    %7 = vector.multi_reduction <add>, %4, %cst_3 [1] : vector<8x256xf32> to vector<8xf32>
    %8 = vector.shape_cast %7 : vector<8xf32> to vector<8x1xf32>
    %cst_4 = arith.constant dense<0.000000e+00> : vector<1xf32>
    %9 = vector.multi_reduction <add>, %8, %cst_4 [0] : vector<8x1xf32> to vector<1xf32>
    %10 = vector.shape_cast %9 : vector<1xf32> to vector<1x1xf32>
    %c0_5 = arith.constant 0 : index
    %c0_6 = arith.constant 0 : index
    %11 = vector.load %arg3[%c0_5, %c0_6] : memref<1x1xf32, #tpu.memory_space<vmem>>, vector<1x1xf32>
    tpu.vector_store %arg3[%c0_5, %c0_6], %10 {strides = array<i32>} : memref<1x1xf32, #tpu.memory_space<vmem>>, vector<1x1xf32>,
    return
  }
  func.func @transform_0(%arg0: i32) -> (i32, i32) {
    %c0_i32 = arith.constant 0 : i32
    %c0_i32_0 = arith.constant 0 : i32
    return %arg0, %c0_i32 : i32, i32
  }
  func.func @transform_1(%arg0: i32) -> (i32, i32) {
    %c0_i32 = arith.constant 0 : i32
    %c0_i32_0 = arith.constant 0 : i32
    return %arg0, %c0_i32 : i32, i32
  }
  func.func @transform_2(%arg0: i32) -> (i32, i32) {
    %c0_i32 = arith.constant 0 : i32
    %c0_i32_0 = arith.constant 0 : i32
    return %arg0, %c0_i32 : i32, i32
  }
}

module attributes {stable_mosaic.version = 11 : i64} {
  func.func @_apply_kernel(%arg0: i32, %arg1: memref<1x1xf32, #tpu.memory_space<smem>>, %arg2: memref<8x256xf32, #tpu.memory_space<vmem>>, %arg3: memref<8x256xi8, #tpu.memory_space<vmem>>, %arg4: memref<8x256xf32, #tpu.memory_space<vmem>>) attributes {dimension_semantics = [#tpu.dimension_semantics<parallel>], iteration_bounds = array<i64: 1>, scalar_prefetch = 0 : i64, scratch_operands = 0 : i64, tpu.core_type = #tpu.core_type<tc>, window_params = [{transform_indices = @transform_0, window_bounds = array<i64: 1, 1>}, {transform_indices = @transform_1, window_bounds = array<i64: 8, 256>}, {transform_indices = @transform_2, window_bounds = array<i64: 8, 256>}, {transform_indices = @transform_3, window_bounds = array<i64: 8, 256>}]} {
    %c0 = arith.constant 0 : index
    %c0_0 = arith.constant 0 : index
    %0 = memref.load %arg1[%c0, %c0_0] : memref<1x1xf32, #tpu.memory_space<smem>>
    %c0_1 = arith.constant 0 : index
    %c0_2 = arith.constant 0 : index
    %1 = vector.load %arg3[%c0_1, %c0_2] : memref<8x256xi8, #tpu.memory_space<vmem>>, vector<8x256xi8>
    %2 = arith.sitofp %1 : vector<8x256xi8> to vector<8x256xf32>
    %c0_3 = arith.constant 0 : index
    %c0_4 = arith.constant 0 : index
    %3 = vector.load %arg2[%c0_3, %c0_4] : memref<8x256xf32, #tpu.memory_space<vmem>>, vector<8x256xf32>
    %4 = vector.broadcast %0 : f32 to vector<8x256xf32>
    %5 = arith.mulf %2, %4 : vector<8x256xf32>
    %6 = arith.mulf %3, %5 : vector<8x256xf32>
    %c0_5 = arith.constant 0 : index
    %c0_6 = arith.constant 0 : index
    %7 = vector.load %arg4[%c0_5, %c0_6] : memref<8x256xf32, #tpu.memory_space<vmem>>, vector<8x256xf32>
    tpu.vector_store %arg4[%c0_5, %c0_6], %6 {strides = array<i32>} : memref<8x256xf32, #tpu.memory_space<vmem>>, vector<8x256xf32>,
    return
  }
  func.func @transform_0(%arg0: i32) -> (i32, i32) {
    %c0_i32 = arith.constant 0 : i32
    %c0_i32_0 = arith.constant 0 : i32
    %c0_i32_1 = arith.constant 0 : i32
    return %c0_i32, %c0_i32_0 : i32, i32
  }
  func.func @transform_1(%arg0: i32) -> (i32, i32) {
    %c0_i32 = arith.constant 0 : i32
    %c0_i32_0 = arith.constant 0 : i32
    return %arg0, %c0_i32 : i32, i32
  }
  func.func @transform_2(%arg0: i32) -> (i32, i32) {
    %c0_i32 = arith.constant 0 : i32
    %c0_i32_0 = arith.constant 0 : i32
    return %arg0, %c0_i32 : i32, i32
  }
  func.func @transform_3(%arg0: i32) -> (i32, i32) {
    %c0_i32 = arith.constant 0 : i32
    %c0_i32_0 = arith.constant 0 : i32
    return %arg0, %c0_i32 : i32, i32
  }
}

</mosaic_0001>

<bundles_post_ra>
// kernel: dropblock_t_1d.2
= control target key start
LH: loop header
LB: loop body
LE: loop exit
PB: predicated region body
PF: predicated region fallthrough
CT: control target
= control target key end

     0   :  { %s122_s0 = inlined_call_operand.vmem [shape: f32[8,256], index: 0, kind: input, shape index: {}]   ;;  %s123_s1 = inlined_call_operand.vmem [shape: s8[8,256], index: 1, kind: output, shape index: {0}]   ;;  %s124_s2 = inlined_call_operand.hbm [shape: f32[1,1], index: 2, kind: output, shape index: {1}]  }
   0x1   :  { %v11_v0 = vld [vmem:[%s122_s0] sm:$0xff]  ;;  %v12_v1 = vld [vmem:[%s122_s0 + $0x8] sm:$0xff] }
   0x2   :  { %8 = vsyncpa [#allocation3], 0  ;;  %vm13_vm0 = vcmp.lt.f32.partialorder %v11_v0, 0.9  ;;  %vm14_vm1 = vcmp.lt.f32.partialorder %v12_v1, 0.9 }
   0x3   :  { %v93_v2 = vmov 0.0   ;;  %s94_s0 = smov [#allocation2]   ;;  %s48_s18 = sshll.u32 %s124_s2, 4  ;;  %vm37_vm2 = vcmask 0   ;;  %s49_s18 = int_to_ptr.hbm [resolvable:$true] %s48_s18 }
   0x4   :  { %v59_v3 = vsel %vm13_vm0, 1.0, %v93_v2  ;;  %v60_v4 = vsel %vm14_vm1, 1.0, %v93_v2  ;;  %s46_s15 = sshll.u32 %s94_s0, 4  ;;  %s47_s15 = int_to_ptr.vmem [resolvable:$true] %s46_s15 }
   0x5   :  { %v19_v5 = vmax.f32 %v59_v3, -128.0  ;;  %v20_v6 = vmax.f32 %v60_v4, -128.0  ;;  %v28_v7 = vadd.f32 %v60_v4, %v59_v3 }
   0x7   :  { %v21_v8 = vmin.f32 %v19_v5, 127.0  ;;  %v22_v9 = vmin.f32 %v20_v6, 127.0  ;;  %29 = vadd.xlane.f32.xlu0 %v28_v7 }
   0x9   :  { %v62_v10 = vcvt.f32.s32 %v21_v8  ;;  %v64_v11 = vcvt.f32.s32 %v22_v9 }
   0xb   :  { %v25_v12 = vpack.c.b16 %v64_v11, %v62_v10 }
   0xd   :  { %v26_v13 = vpack.c.b8 %v25_v12, %v25_v12 }
   0xf   :  { %27 = vst [vmem:[%s123_s1] sm:$0xf] %v26_v13 }
  0x7a   :  { %v30_v14 = vpop.xlane.xlu0 %29 }
  0x7b   :  { %v31_v15 = vrot.slane %v30_v14, 4 }
  0x7d   :  { %v32_v16 = vadd.f32 %v31_v15, %v30_v14 }
  0x7f   :  { %v33_v17 = vrot.slane %v32_v16, 2 }
  0x81   :  { %v34_v18 = vadd.f32 %v33_v17, %v32_v16 }
  0x83   :  { %v35_v19 = vrot.slane %v34_v18, 1 }
  0x85   :  { %v36_v20 = vadd.f32 %v35_v19, %v34_v18 }
  0x87   :  { %38 = vst.msk [vmem:[#allocation2] sm:$0x1] %vm37_vm2, %v36_v20 }
  0x88   :  { %51 = dma.vmem_to_hbm [thread:$0]  %s47_s15, 16, %s49_s18, [#allocation3]  }
  0x89   :  { %91 = dma.done.wait [#allocation3], 16  }
  0x8a   :  { %92 = vsyncadd [#allocation3], 4294967280 }
  0x8b   :  { %58 = vsyncpa [#allocation3], 1 }

// kernel: dropblock_t_1d.3
= control target key start
LH: loop header
LB: loop body
LE: loop exit
PB: predicated region body
PF: predicated region fallthrough
CT: control target
= control target key end

     0   :  { %s72_s0 = inlined_call_operand.<no memory space> [shape: f32[1,1], index: 0, kind: input, shape index: {}]   ;;  %s73_s2 = inlined_call_operand.vmem [shape: s8[8,256], index: 2, kind: input, shape index: {}]   ;;  %s74_s1 = inlined_call_operand.vmem [shape: f32[8,256], index: 1, kind: input, shape index: {}]   ;;  %s75_s3 = inlined_call_operand.vmem [shape: f32[8,256], index: 3, kind: output, shape index: {}]  }
   0x1   :  { %v16_v0 = vld [vmem:[%s73_s2] sm:$0xf]  ;;  %v23_v3 = vstv %s72_s0  ;;  %v22_v7 = vld [vmem:[%s74_s1 + $0x8] sm:$0xff] }
   0x2   :  { %v17_v1 = vunpack.c.0.s8 %v16_v0  ;;  %v18_v2 = vunpack.c.1.s8 %v16_v0  ;;  %v21_v6 = vld [vmem:[%s74_s1] sm:$0xff] }
   0x4   :  { %v19_v4 = vcvt.s32.f32 %v17_v1  ;;  %v20_v5 = vcvt.s32.f32 %v18_v2 }
   0x6   :  { %v24_v8 = vmul.f32 %v23_v3, %v19_v4  ;;  %v25_v9 = vmul.f32 %v23_v3, %v20_v5 }
   0x8   :  { %v26_v10 = vmul.f32 %v24_v8, %v21_v6  ;;  %v27_v11 = vmul.f32 %v25_v9, %v22_v7 }
   0xa   :  { %28 = vst [vmem:[%s75_s3] sm:$0xff] %v26_v10 }
   0xb   :  { %29 = vst [vmem:[%s75_s3 + $0x8] sm:$0xff] %v27_v11 }

</bundles_post_ra>
